<compile_context>
chip_gen: v5e
topology: v5e:2x2
jax: 0.10.0
libtpu: 0.0.40
codegen_flags: <defaults>
</compile_context>

<pallas_src>
import functools

import jax
import jax.numpy as jnp
import numpy as np
from jax import lax
from jax.experimental import pallas as pl
from jax.experimental.pallas import tpu as pltpu


# ------------------------------ Fused kernel --------------------------------
def cbam_fused_kernel(x_ref, w1t_ref, w2t_ref, wmat_ref, out_ref, *, bblk):
    # x_ref:    (Bblk, C, HW)   activations, HW on the lane axis
    # w1t_ref:  (C, hidden)     fc1 weight, pre-transposed in the wrapper
    # w2t_ref:  (hidden, C)     fc2 weight, pre-transposed in the wrapper
    # wmat_ref: (2*HW, HW)      7x7 conv (incl. zero padding) as one dense matrix
    # out_ref:  (Bblk, C, HW)
    x = x_ref[...].astype(jnp.float32)                        # (Bblk, C, HW)

    # ---- channel attention: shared MLP on avg- and max-pooled stats --------
    avg = jnp.mean(x, axis=2)                                  # (Bblk, C)
    mx = jnp.max(x, axis=2)                                    # (Bblk, C)
    stats = jnp.concatenate([avg, mx], axis=0)                 # (2*Bblk, C)
    h = jnp.maximum(
        jnp.dot(stats, w1t_ref[...],
                preferred_element_type=jnp.float32), 0.0)      # (2*Bblk, hidden)
    # fc2(relu(fc1(avg))) + fc2(relu(fc1(max))) == (h_avg + h_max) @ w2.T
    h_sum = h[:bblk] + h[bblk:]                                # (Bblk, hidden)
    o = jnp.dot(h_sum, w2t_ref[...],
                preferred_element_type=jnp.float32)            # (Bblk, C)
    ca = jax.nn.sigmoid(o)                                     # (Bblk, C)
    y = x * ca[:, :, None]                                     # (Bblk, C, HW)

    # ---- spatial attention: channel mean/max -> 7x7 conv as ONE matmul -----
    mean_c = jnp.mean(y, axis=1)                               # (Bblk, HW)
    max_c = jnp.max(y, axis=1)                                 # (Bblk, HW)
    pooled = jnp.concatenate([mean_c, max_c], axis=1)          # (Bblk, 2*HW)
    sa = jax.nn.sigmoid(
        jnp.dot(pooled, wmat_ref[...],
                preferred_element_type=jnp.float32))           # (Bblk, HW)

    out_ref[...] = (y * sa[:, None, :]).astype(out_ref.dtype)  # lane-dense store


# ------------------------------ Wrapper helpers ------------------------------
def _conv_as_matrix(wconv, H, W):
    """Dense (2*H*W, H*W) matrix implementing the KxK 'same' cross-correlation.

    M[c*H*W + hp*W + wp, h*W + w] = wconv[c, hp-h+pad, wp-w+pad] when both
    offsets lie inside the kernel window, else 0 (this also encodes the zero
    padding at the borders, so no padded scratch is needed in the kernel)."""
    K = wconv.shape[-1]
    pad = K // 2
    hp = jnp.arange(H).reshape(H, 1, 1, 1)
    wp = jnp.arange(W).reshape(1, W, 1, 1)
    ho = jnp.arange(H).reshape(1, 1, H, 1)
    wo = jnp.arange(W).reshape(1, 1, 1, W)
    di = hp - ho + pad                                         # (H,1,H,1)
    dj = wp - wo + pad                                         # (1,W,1,W)
    valid = (di >= 0) & (di < K) & (dj >= 0) & (dj < K)        # (H,W,H,W)
    taps = wconv[:, jnp.clip(di, 0, K - 1), jnp.clip(dj, 0, K - 1)]  # (2,H,W,H,W)
    mat = jnp.where(valid[None], taps, 0.0)
    return mat.reshape(2 * H * W, H * W).astype(jnp.float32)


def _choose_bblk(B, per_sample_bytes, target_bytes=1 << 20):
    """Samples per grid step: large enough to amortize ~0.35us/step overhead,
    but keep >= 2 grid steps (both v7x TensorCores) and B % Bblk == 0."""
    bblk = max(1, min(B, target_bytes // max(per_sample_bytes, 1)))
    while bblk > 1 and B // bblk < 2:
        bblk -= 1
    while B % bblk:
        bblk -= 1
    return bblk


# -------------------------------- Wrapper ------------------------------------
def cbam_pallas(x, w1, w2, wconv, *, io_dtype=jnp.float32):
    """x: (B,C,H,W); w1: (hidden,C); w2: (C,hidden); wconv: (2,K,K)."""
    B, C, H, W = x.shape
    HW = H * W
    hidden = w1.shape[0]

    # Flatten HW onto the lane axis; HBM I/O dtype selectable (bf16 on v6e/v7x).
    x_flat = x.reshape(B, C, HW).astype(io_dtype)
    w1t = jnp.asarray(w1, jnp.float32).T                       # (C, hidden)
    w2t = jnp.asarray(w2, jnp.float32).T                       # (hidden, C)
    wmat = _conv_as_matrix(jnp.asarray(wconv, jnp.float32), H, W)  # (2*HW, HW)

    io_bytes = jnp.dtype(io_dtype).itemsize
    bblk = _choose_bblk(B, C * HW * io_bytes)
    grid = (B // bblk,)

    # Re-derive the VMEM cap from the actual footprint: double-buffered in+out
    # blocks + (conservatively double-buffered) weights + compiler headroom,
    # clamped to v7x's 64 MiB physical VMEM.
    block_bytes = bblk * C * HW * io_bytes
    weight_bytes = (2 * HW * HW + 2 * hidden * C) * 4
    vmem_limit = int(min(64 * 1024 * 1024,
                         max(16 * 1024 * 1024,
                             4 * block_bytes + 2 * weight_bytes + 4 * 1024 * 1024)))

    out_flat = pl.pallas_call(
        functools.partial(cbam_fused_kernel, bblk=bblk),
        out_shape=jax.ShapeDtypeStruct((B, C, HW), io_dtype),
        grid=grid,
        in_specs=[
            pl.BlockSpec((bblk, C, HW), lambda b: (b, 0, 0)),   # x (lane-dense)
            pl.BlockSpec((C, hidden), lambda b: (0, 0)),        # fc1 weight^T
            pl.BlockSpec((hidden, C), lambda b: (0, 0)),        # fc2 weight^T
            pl.BlockSpec((2 * HW, HW), lambda b: (0, 0)),       # conv-as-matrix
        ],
        out_specs=pl.BlockSpec((bblk, C, HW), lambda b: (b, 0, 0)),
        compiler_params=pltpu.CompilerParams(
            dimension_semantics=("parallel",),
            vmem_limit_bytes=vmem_limit,
        ),
    )(x_flat, w1t, w2t, wmat)

    return out_flat.reshape(B, C, H, W)


# ------------------------------- Reference -----------------------------------
def cbam_ref(x, w1, w2, wconv):
    pad = wconv.shape[-1] // 2
    avg = x.mean(axis=(2, 3))                                  # (B, C)
    mx = x.max(axis=(2, 3))                                    # (B, C)

    def fc(v):
        h = jnp.maximum(jnp.dot(v, w1.T, precision="highest"), 0.0)
        return jnp.dot(h, w2.T, precision="highest")

    ca = jax.nn.sigmoid(fc(avg) + fc(mx))                      # (B, C)
    y = x * ca[:, :, None, None]

    mean_c = y.mean(axis=1, keepdims=True)
    max_c = y.max(axis=1, keepdims=True)
    pooled = jnp.concatenate([mean_c, max_c], axis=1)          # (B, 2, H, W)
    sa = lax.conv_general_dilated(
        pooled, wconv[None], window_strides=(1, 1),
        padding=((pad, pad), (pad, pad)),
        dimension_numbers=("NCHW", "OIHW", "NCHW"),
        precision="highest")
    return y * jax.nn.sigmoid(sa)                              # (B, C, H, W)


if __name__ == "__main__":
    B, C, H, W = 2, 32, 16, 16
    reduction = 16
    hidden = C // reduction                                    # = 2
    K = 7

    key = jax.random.PRNGKey(0)
    kx, k1, k2, k3 = jax.random.split(key, 4)
    x = jax.random.normal(kx, (B, C, H, W), dtype=jnp.float32)
    # nn.Linear(C, C//r, bias=False).weight -> (hidden, C)
    w1 = jax.random.normal(k1, (hidden, C), dtype=jnp.float32) * 0.2
    # nn.Linear(C//r, C, bias=False).weight -> (C, hidden)
    w2 = jax.random.normal(k2, (C, hidden), dtype=jnp.float32) * 0.2
    # nn.Conv2d(2, 1, 7, padding=3, bias=False).weight[0] -> (2, 7, 7)
    wconv = jax.random.normal(k3, (2, K, K), dtype=jnp.float32) * 0.1

    # ---- f32 HBM I/O path ----------------------------------------------------
    out = jax.jit(cbam_pallas)(x, w1, w2, wconv)
    jax.block_until_ready(out)
    ref = cbam_ref(x, w1, w2, wconv)
    # Tolerance absorbs possible MXU pass-precision differences between the
    # Pallas matmuls and the XLA reference while still catching structural bugs.
    np.testing.assert_allclose(np.asarray(out), np.asarray(ref),
                               rtol=2e-2, atol=2e-2)

    # ---- bf16 HBM I/O, f32 compute (production config for v6e/v7x) -----------
    out_bf16 = jax.jit(functools.partial(cbam_pallas, io_dtype=jnp.bfloat16))(
        x, w1, w2, wconv)
    jax.block_until_ready(out_bf16)
    ref_bf16 = cbam_ref(x.astype(jnp.bfloat16).astype(jnp.float32), w1, w2, wconv)
    np.testing.assert_allclose(np.asarray(out_bf16.astype(jnp.float32)),
                               np.asarray(ref_bf16), rtol=4e-2, atol=4e-2)

    print("KERNEL_OK")
</pallas_src>

<mosaic_0001>
module attributes {stable_mosaic.version = 11 : i64} {
  func.func @cbam_fused_kernel(%arg0: i32, %arg1: memref<1x32x256xf32, #tpu.memory_space<vmem>>, %arg2: memref<32x2xf32, #tpu.memory_space<vmem>>, %arg3: memref<2x32xf32, #tpu.memory_space<vmem>>, %arg4: memref<512x256xf32, #tpu.memory_space<vmem>>, %arg5: memref<1x32x256xf32, #tpu.memory_space<vmem>>) attributes {dimension_semantics = [#tpu.dimension_semantics<parallel>], iteration_bounds = array<i64: 2>, scalar_prefetch = 0 : i64, scratch_operands = 0 : i64, tpu.core_type = #tpu.core_type<tc>, window_params = [{transform_indices = @transform_0, window_bounds = array<i64: 1, 32, 256>}, {pipeline_mode = #tpu.pipeline_mode<synchronous>, transform_indices = @transform_1, window_bounds = array<i64: 32, 2>}, {pipeline_mode = #tpu.pipeline_mode<synchronous>, transform_indices = @transform_2, window_bounds = array<i64: 2, 32>}, {pipeline_mode = #tpu.pipeline_mode<synchronous>, transform_indices = @transform_3, window_bounds = array<i64: 512, 256>}, {transform_indices = @transform_4, window_bounds = array<i64: 1, 32, 256>}]} {
    %c0 = arith.constant 0 : index
    %c0_0 = arith.constant 0 : index
    %c0_1 = arith.constant 0 : index
    %0 = vector.load %arg1[%c0, %c0_0, %c0_1] : memref<1x32x256xf32, #tpu.memory_space<vmem>>, vector<1x32x256xf32>
    %cst = arith.constant dense<0.000000e+00> : vector<1x32xf32>
    %1 = vector.multi_reduction <add>, %0, %cst [2] : vector<1x32x256xf32> to vector<1x32xf32>
    %cst_2 = arith.constant 2.560000e+02 : f32
    %2 = vector.broadcast %cst_2 : f32 to vector<1x32xf32>
    %3 = arith.divf %1, %2 : vector<1x32xf32>
    %cst_3 = arith.constant dense<0xFF800000> : vector<1x32xf32>
    %4 = vector.multi_reduction <maximumf>, %0, %cst_3 [2] : vector<1x32x256xf32> to vector<1x32xf32>
    %5 = tpu.concatenate %3, %4 in 0 : vector<1x32xf32>, vector<1x32xf32> -> vector<2x32xf32>
    %c0_4 = arith.constant 0 : index
    %c0_5 = arith.constant 0 : index
    %6 = vector.load %arg2[%c0_4, %c0_5] : memref<32x2xf32, #tpu.memory_space<vmem>>, vector<32x2xf32>
    %cst_6 = arith.constant dense<0.000000e+00> : vector<2x2xf32>
    %7 = tpu.matmul %5, %6, %cst_6 {dimension_numbers = #tpu.dot_dimension_numbers<[1], [0], [0], [1], [0, 0, 1, 1], [], []>} : vector<2x32xf32>, vector<32x2xf32>, vector<2x2xf32> -> vector<2x2xf32>
    %cst_7 = arith.constant 0.000000e+00 : f32
    %8 = vector.broadcast %cst_7 : f32 to vector<2x2xf32>
    %9 = arith.maximumf %7, %8 : vector<2x2xf32>
    %10 = vector.extract_strided_slice %9 {offsets = [0, 0], sizes = [1, 2], strides = [1, 1]} : vector<2x2xf32> to vector<1x2xf32>
    %11 = vector.extract_strided_slice %9 {offsets = [1, 0], sizes = [1, 2], strides = [1, 1]} : vector<2x2xf32> to vector<1x2xf32>
    %12 = arith.addf %10, %11 : vector<1x2xf32>
    %c0_8 = arith.constant 0 : index
    %c0_9 = arith.constant 0 : index
    %13 = vector.load %arg3[%c0_8, %c0_9] : memref<2x32xf32, #tpu.memory_space<vmem>>, vector<2x32xf32>
    %cst_10 = arith.constant dense<0.000000e+00> : vector<1x32xf32>
    %14 = tpu.matmul %12, %13, %cst_10 {dimension_numbers = #tpu.dot_dimension_numbers<[1], [0], [0], [1], [0, 0, 1, 1], [], []>} : vector<1x2xf32>, vector<2x32xf32>, vector<1x32xf32> -> vector<1x32xf32>
    %15 = arith.negf %14 : vector<1x32xf32>
    %16 = math.exp %15 : vector<1x32xf32>
    %cst_11 = arith.constant 1.000000e+00 : f32
    %17 = vector.broadcast %cst_11 : f32 to vector<1x32xf32>
    %18 = arith.addf %17, %16 : vector<1x32xf32>
    %19 = arith.divf %17, %18 : vector<1x32xf32>
    %20 = vector.shape_cast %19 : vector<1x32xf32> to vector<1x32x1xf32>
    %21 = vector.broadcast %20 : vector<1x32x1xf32> to vector<1x32x256xf32>
    %22 = arith.mulf %0, %21 : vector<1x32x256xf32>
    %cst_12 = arith.constant dense<0.000000e+00> : vector<1x256xf32>
    %23 = vector.multi_reduction <add>, %22, %cst_12 [1] : vector<1x32x256xf32> to vector<1x256xf32>
    %cst_13 = arith.constant 3.200000e+01 : f32
    %24 = vector.broadcast %cst_13 : f32 to vector<1x256xf32>
    %25 = arith.divf %23, %24 : vector<1x256xf32>
    %cst_14 = arith.constant dense<0xFF800000> : vector<1x256xf32>
    %26 = vector.multi_reduction <maximumf>, %22, %cst_14 [1] : vector<1x32x256xf32> to vector<1x256xf32>
    %27 = tpu.concatenate %25, %26 in 1 : vector<1x256xf32>, vector<1x256xf32> -> vector<1x512xf32>
    %c0_15 = arith.constant 0 : index
    %c0_16 = arith.constant 0 : index
    %28 = vector.load %arg4[%c0_15, %c0_16] : memref<512x256xf32, #tpu.memory_space<vmem>>, vector<512x256xf32>
    %cst_17 = arith.constant dense<0.000000e+00> : vector<1x256xf32>
    %29 = tpu.matmul %27, %28, %cst_17 {dimension_numbers = #tpu.dot_dimension_numbers<[1], [0], [0], [1], [0, 0, 1, 1], [], []>} : vector<1x512xf32>, vector<512x256xf32>, vector<1x256xf32> -> vector<1x256xf32>
    %30 = arith.negf %29 : vector<1x256xf32>
    %31 = math.exp %30 : vector<1x256xf32>
    %cst_18 = arith.constant 1.000000e+00 : f32
    %32 = vector.broadcast %cst_18 : f32 to vector<1x256xf32>
    %33 = arith.addf %32, %31 : vector<1x256xf32>
    %34 = arith.divf %32, %33 : vector<1x256xf32>
    %35 = vector.shape_cast %34 : vector<1x256xf32> to vector<1x1x256xf32>
    %36 = vector.broadcast %35 : vector<1x1x256xf32> to vector<1x32x256xf32>
    %37 = arith.mulf %22, %36 : vector<1x32x256xf32>
    %c0_19 = arith.constant 0 : index
    %c0_20 = arith.constant 0 : index
    %c0_21 = arith.constant 0 : index
    %38 = vector.load %arg5[%c0_19, %c0_20, %c0_21] : memref<1x32x256xf32, #tpu.memory_space<vmem>>, vector<1x32x256xf32>
    tpu.vector_store %arg5[%c0_19, %c0_20, %c0_21], %37 {strides = array<i32>} : memref<1x32x256xf32, #tpu.memory_space<vmem>>, vector<1x32x256xf32>,
    return
  }
  func.func @transform_0(%arg0: i32) -> (i32, i32, i32) {
    %c0_i32 = arith.constant 0 : i32
    %c0_i32_0 = arith.constant 0 : i32
    %c0_i32_1 = arith.constant 0 : i32
    return %arg0, %c0_i32, %c0_i32_0 : i32, i32, i32
  }
  func.func @transform_1(%arg0: i32) -> (i32, i32) {
    %c0_i32 = arith.constant 0 : i32
    %c0_i32_0 = arith.constant 0 : i32
    %c0_i32_1 = arith.constant 0 : i32
    return %c0_i32, %c0_i32_0 : i32, i32
  }
  func.func @transform_2(%arg0: i32) -> (i32, i32) {
    %c0_i32 = arith.constant 0 : i32
    %c0_i32_0 = arith.constant 0 : i32
    %c0_i32_1 = arith.constant 0 : i32
    return %c0_i32, %c0_i32_0 : i32, i32
  }
  func.func @transform_3(%arg0: i32) -> (i32, i32) {
    %c0_i32 = arith.constant 0 : i32
    %c0_i32_0 = arith.constant 0 : i32
    %c0_i32_1 = arith.constant 0 : i32
    return %c0_i32, %c0_i32_0 : i32, i32
  }
  func.func @transform_4(%arg0: i32) -> (i32, i32, i32) {
    %c0_i32 = arith.constant 0 : i32
    %c0_i32_0 = arith.constant 0 : i32
    %c0_i32_1 = arith.constant 0 : i32
    return %arg0, %c0_i32, %c0_i32_0 : i32, i32, i32
  }
}

</mosaic_0001>

<bundles_post_ra>
// kernel: cbam_pallas.1
= control target key start
LH: loop header
LB: loop body
LE: loop exit
PB: predicated region body
PF: predicated region fallthrough
CT: control target
= control target key end

     0   :  { %s918_s15 = smov 0   ;;  %s1427_s0 = inlined_call_operand.vmem [shape: f32[2,32,256], index: 0, kind: input, shape index: {}]   ;;  %s1428_s1 = inlined_call_operand.vmem [shape: f32[32,2], index: 1, kind: input, shape index: {}]   ;;  %s1429_s2 = inlined_call_operand.vmem [shape: f32[2,32], index: 2, kind: input, shape index: {}]   ;;  %s1430_s3 = inlined_call_operand.vmem [shape: f32[512,256], index: 3, kind: input, shape index: {}]   ;;  %s1431_s4 = inlined_call_operand.vmem [shape: f32[2,32,256], index: 4, kind: output, shape index: {}]  }
   0x1 LB: > { %s833_s16 = sadd.s32 4294967295, %s889_s15   ;;  %p837_p0 = scmp.ge.s32.totalorder %s889_s15, 1  ;;  %s889_s15 = sphi %s918_s15, %s14_s15  }
   0x2   : > { %p162_p1 = scmp.lt.s32.totalorder %s889_s15, 3 }
   0x4   : > { %p163_p2 = pnand %p837_p0, %p162_p1 }
   0x5   : > { %p188_p3 = scmp.lt.s32.totalorder (!%p163_p2), %s833_s16, 1 }
   0x6   : > { %166 = sbr.rel (%p163_p2) target bundleno = 762 (0x2fa), region = 36 }
   0xb   : > { %s1433_s16 = smov (!%p188_p3, %s833_s16), 1  ;;  %v891_v16 = vmov 256.0   ;;  %v278_v17 = vld [vmem:[%s1428_s1 + $0x18] sm:$0xff]  ;;  %v277_v18 = vld [vmem:[%s1428_s1 + $0x10] sm:$0xff]  ;;  %v276_v20 = vld [vmem:[%s1428_s1 + $0x8] sm:$0xff]  ;;  %v245_v29 = vlaneseq  ;;  %vm250_vm1 = vcmask 130112  }
   0xc   : > { %s850_s17 = sshll.u32 %s1433_s16, 6  ;;  %867 = vrcp.f32 %v891_v16  ;;  %295 = vmatpush.msra.mxu0 %v278_v17  ;;  %v275_v21 = vld [vmem:[%s1428_s1] sm:$0xff]  ;;  %vm254_vm2 = vcmask 195712   ;;  %vm258_vm3 = vcmask 261312   ;;  %vm273_vm4 = vcmask 1040384   ;;  %v560_v16 = vld [vmem:[%s1430_s3 + $0x3f0] sm:$0xff] }
   0xd   : > { %s192_s20 = scalar_lea.vmem %s1427_s0, %s850_s17  ;;  %v246_v31 = vand.u32 127, %v245_v29  ;;  %vm279_vm5 = vcmask 261120   ;;  %v308_v59 = vld [vmem:[%s1429_s2] sm:$0x3]  ;;  %vm313_vm6 = vcmask 1041408   ;;  %vm309_vm7 = vcmask 15360   ;;  %s197_s10 = scalar_lea.vmem %s1431_s4, %s850_s17 }
   0xe   : > { %v934_v0 = vld [vmem:[%s192_s20] sm:$0xff]  ;;  %v936_v1 = vld [vmem:[%s192_s20 + $0x8] sm:$0xff]  ;;  %v948_v7 = vld [vmem:[%s192_s20 + $0x10] sm:$0xff]  ;;  %296 = vmatpush.msra.mxu0 %v277_v18  ;;  %843 = vmatpush.msk.msra.mxu1 %vm313_vm6, %v308_v59 }
   0xf   : > { %v938_v2 = vld [vmem:[%s192_s20 + $0x20] sm:$0xff]  ;;  %v229_v3 = vmax.f32 %v934_v0, %v936_v1  ;;  %v206_v4 = vadd.f32 %v936_v1, %v934_v0  ;;  %v944_v5 = vld [vmem:[%s192_s20 + $0x28] sm:$0xff]  ;;  %v950_v8 = vld [vmem:[%s192_s20 + $0x18] sm:$0xff]  ;;  %v248_v34 = vadd.s32 4294967288, %v246_v31  ;;  %v252_v37 = vadd.s32 4294967280, %v246_v31 }
  0x10   : > { %v212_v6 = vadd.f32 %v944_v5, %v938_v2  ;;  %v952_v9 = vld [vmem:[%s192_s20 + $0x30] sm:$0xff]  ;;  %v954_v10 = vld [vmem:[%s192_s20 + $0x38] sm:$0xff]  ;;  %v232_v11 = vmax.f32 %v948_v7, %v950_v8  ;;  %v209_v12 = vadd.f32 %v950_v8, %v948_v7  ;;  %v235_v14 = vmax.f32 %v938_v2, %v944_v5  ;;  %297 = vmatpush.msra.mxu0 %v276_v20  ;;  %v526_v17 = vld [vmem:[%s1430_s3 + $0x2e0] sm:$0xff] }
  0x11   : > { %230 = vmax.xlane.f32.xlu2 %v229_v3  ;;  %207 = vadd.xlane.f32.xlu0 %v206_v4  ;;  %v215_v13 = vadd.f32 %v954_v10, %v952_v9  ;;  %v238_v15 = vmax.f32 %v952_v9, %v954_v10  ;;  %v256_v42 = vadd.s32 4294967272, %v246_v31  ;;  %v981_v3 = vshrl.u32 %v245_v29, 7  ;;  %v558_v18 = vld [vmem:[%s1430_s3 + $0x3e0] sm:$0xff]  ;;  %v496_v20 = vld [vmem:[%s1430_s3 + $0x1f0] sm:$0xff] }
  0x12   : > { %213 = vadd.xlane.f32.xlu1 %v212_v6  ;;  %v868_v19 = vpop.eup %867  ;;  %298 = vmatpush.msra.mxu0 %v275_v21  ;;  %v460_v29 = vld [vmem:[%s1430_s3 + $0xd0] sm:$0xff]  ;;  %v450_v59 = vld [vmem:[%s1430_s3 + $0x80] sm:$0xff] }
  0x13   : > { %v219_v22 = vmul.f32 256.0, %v868_v19  ;;  %vm223_vm0 = vweird.f32 %v868_v19  ;;  %862 = vset.pattern.permute.xlu2 %v981_v3  ;;  %v371_v4 = vadd.s32 16, %v981_v3  ;;  %v365_v6 = vadd.s32 8, %v981_v3  ;;  %582 = vmatpush.msra.mxu3 %v496_v20  ;;  %v474_v20 = vld [vmem:[%s1430_s3 + $0x140] sm:$0xff] }
  0x14   : > { %622 = vmatpush.msrb.mxu0 %v560_v16  ;;  %v476_v16 = vld [vmem:[%s1430_s3 + $0x150] sm:$0xff] }
  0x15   : > { %v220_v23 = vsub.f32 1.0, %v219_v22  ;;  %864 = vset.pattern.permute.xlu1 %v371_v4  ;;  %863 = vset.pattern.permute.xlu0 %v365_v6  ;;  %v524_v22 = vld [vmem:[%s1430_s3 + $0x2d0] sm:$0xff] }
  0x16   : > { %623 = vmatpush.msrb.mxu0 %v558_v18  ;;  %v508_v4 = vld [vmem:[%s1430_s3 + $0x250] sm:$0xff] }
  0x17   : > { %v221_v24 = vmul.f32 %v868_v19, %v220_v23  ;;  %v556_v23 = vld [vmem:[%s1430_s3 + $0x3d0] sm:$0xff] }
  0x18   : > { %624 = vmatpush.msrb.mxu0 %v556_v23  ;;  %v540_v6 = vld [vmem:[%s1430_s3 + $0x350] sm:$0xff] }
  0x19   : > { %233 = vmax.xlane.f32.xlu2 %v232_v11  ;;  %210 = vadd.xlane.f32.xlu0 %v209_v12  ;;  %v222_v27 = vadd.f32 %v868_v19, %v221_v24  ;;  %v462_v24 = vld [vmem:[%s1430_s3 + $0xe0] sm:$0xff]  ;;  %v536_v18 = vld [vmem:[%s1430_s3 + $0x330] sm:$0xff] }
  0x1a   : > { %216 = vadd.xlane.f32.xlu1 %v215_v13  ;;  %v440_v23 = vld [vmem:[%s1430_s3 + $0x30] sm:$0xff] }
  0x1b   : > { %v224_v30 = vsel %vm223_vm0, %v868_v19, %v222_v27  ;;  %v464_v19 = vld [vmem:[%s1430_s3 + $0xf0] sm:$0xff]  ;;  %v522_v27 = vld [vmem:[%s1430_s3 + $0x2c0] sm:$0xff] }
  0x1c   : > { %562 = vmatpush.msra.mxu2 %v464_v19  ;;  %v442_v19 = vld [vmem:[%s1430_s3 + $0x40] sm:$0xff] }
  0x1e   : > { %563 = vmatpush.msra.mxu2 %v462_v24  ;;  %v472_v24 = vld [vmem:[%s1430_s3 + $0x130] sm:$0xff] }
  0x20   : > { %564 = vmatpush.msra.mxu2 %v460_v29  ;;  %v498_v29 = vld [vmem:[%s1430_s3 + $0x200] sm:$0xff] }
  0x21   : > { %236 = vmax.xlane.f32.xlu0 %v235_v14 }
  0x22   : > { %239 = vmax.xlane.f32.xlu1 %v238_v15  ;;  %v528_v15 = vld [vmem:[%s1430_s3 + $0x2f0] sm:$0xff] }
  0x23   : > { %602 = vmatpush.msrb.mxu1 %v528_v15  ;;  %v444_v15 = vld [vmem:[%s1430_s3 + $0x50] sm:$0xff] }
  0x25   : > { %603 = vmatpush.msrb.mxu1 %v526_v17  ;;  %v504_v17 = vld [vmem:[%s1430_s3 + $0x230] sm:$0xff] }
  0x27   : > { %604 = vmatpush.msrb.mxu1 %v524_v22  ;;  %v534_v22 = vld [vmem:[%s1430_s3 + $0x320] sm:$0xff] }
  0x29   : > { %605 = vmatpush.msrb.mxu1 %v522_v27  ;;  %v438_v27 = vld [vmem:[%s1430_s3 + $0x20] sm:$0xff] }
  0x84   : > { %v208_v25 = vpop.xlane.xlu0 %207  ;;  %v231_v26 = vpop.xlane.xlu2 %230 }
  0x85   : > { %v214_v28 = vpop.xlane.xlu1 %213  ;;  %v225_v32 = vmul.f32 %v224_v30, %v208_v25  ;;  %v265_v44 = vperm.slane %v231_v26, %v246_v31  ;;  %v494_v26 = vld [vmem:[%s1430_s3 + $0x1e0] sm:$0xff] }
  0x86   : > { %v227_v38 = vmul.f32 %v224_v30, %v214_v28  ;;  %583 = vmatpush.msra.mxu3 %v494_v26  ;;  %v554_v28 = vld [vmem:[%s1430_s3 + $0x3c0] sm:$0xff]  ;;  %v532_v26 = vld [vmem:[%s1430_s3 + $0x310] sm:$0xff] }
  0x87   : > { %v247_v41 = vperm.slane %v225_v32, %v246_v31  ;;  %v458_v32 = vld [vmem:[%s1430_s3 + $0xc0] sm:$0xff]  ;;  %625 = vmatpush.msrb.mxu0 %v554_v28 }
  0x88   : > { %v253_v47 = vperm.slane %v227_v38, %v252_v37  ;;  %565 = vmatpush.msra.mxu2 %v458_v32  ;;  %v470_v28 = vld [vmem:[%s1430_s3 + $0x120] sm:$0xff]  ;;  %v561_v32 = vld [vmem:[%s1430_s3 + $0x3f8] sm:$0xff] }
  0x8c   : > { %v211_v33 = vpop.xlane.xlu0 %210  ;;  %v234_v39 = vpop.xlane.xlu2 %233 }
  0x8d   : > { %v226_v35 = vmul.f32 %v224_v30, %v211_v33  ;;  %v217_v36 = vpop.xlane.xlu1 %216  ;;  %v266_v45 = vperm.slane %v234_v39, %v248_v34  ;;  %v518_v39 = vld [vmem:[%s1430_s3 + $0x2a0] sm:$0xff] }
  0x8e   : > { %v228_v43 = vmul.f32 %v224_v30, %v217_v36  ;;  %v492_v30 = vld [vmem:[%s1430_s3 + $0x1d0] sm:$0xff]  ;;  %v490_v36 = vld [vmem:[%s1430_s3 + $0x1c0] sm:$0xff] }
  0x8f   : > { %v249_v40 = vperm.slane %v226_v35, %v248_v34  ;;  %v267_v53 = vsel %vm250_vm1, %v266_v45, %v265_v44  ;;  %584 = vmatpush.msra.mxu3 %v492_v30  ;;  %v520_v34 = vld [vmem:[%s1430_s3 + $0x2b0] sm:$0xff]  ;;  %v530_v30 = vld [vmem:[%s1430_s3 + $0x300] sm:$0xff] }
  0x90   : > { %v257_v48 = vperm.slane %v228_v43, %v256_v42  ;;  %v552_v35 = vld [vmem:[%s1430_s3 + $0x3b0] sm:$0xff]  ;;  %606 = vmatpush.msrb.mxu1 %v520_v34 }
  0x91   : > { %v251_v46 = vsel %vm250_vm1, %v249_v40, %v247_v41  ;;  %585 = vmatpush.msra.mxu3 %v490_v36  ;;  %v550_v40 = vld [vmem:[%s1430_s3 + $0x3a0] sm:$0xff]  ;;  %626 = vmatpush.msrb.mxu0 %v552_v35  ;;  %v468_v34 = vld [vmem:[%s1430_s3 + $0x110] sm:$0xff]  ;;  %v527_v35 = vld [vmem:[%s1430_s3 + $0x2e8] sm:$0xff] }
  0x92   : > { %v255_v52 = vsel %vm254_vm2, %v253_v47, %v251_v46  ;;  %607 = vmatpush.msrb.mxu1 %v518_v39  ;;  %v377_v46 = vadd.s32 24, %v981_v3  ;;  %v456_v47 = vld [vmem:[%s1430_s3 + $0xb0] sm:$0xff]  ;;  %v559_v36 = vld [vmem:[%s1430_s3 + $0x3e8] sm:$0xff]  ;;  %v465_v39 = vld [vmem:[%s1430_s3 + $0xf8] sm:$0xff] }
  0x93   : > { %v259_v56 = vsel %vm258_vm3, %v257_v48, %v255_v52  ;;  %627 = vmatpush.msrb.mxu0 %v550_v40  ;;  %v488_v48 = vld [vmem:[%s1430_s3 + $0x1b0] sm:$0xff]  ;;  %566 = vmatpush.msra.mxu2 %v456_v47  ;;  %v486_v52 = vld [vmem:[%s1430_s3 + $0x1a0] sm:$0xff]  ;;  %v497_v40 = vld [vmem:[%s1430_s3 + $0x1f8] sm:$0xff] }
  0x94   : > { %v237_v49 = vpop.xlane.xlu0 %236  ;;  %586 = vmatpush.msra.mxu3 %v488_v48  ;;  %v480_v3 = vld [vmem:[%s1430_s3 + $0x170] sm:$0xff]  ;;  %v461_v47 = vld [vmem:[%s1430_s3 + $0xd8] sm:$0xff] }
  0x95   : > { %v268_v50 = vperm.slane %v237_v49, %v252_v37  ;;  %v240_v51 = vpop.xlane.xlu1 %239  ;;  %v516_v49 = vld [vmem:[%s1430_s3 + $0x290] sm:$0xff]  ;;  %v493_v48 = vld [vmem:[%s1430_s3 + $0x1d8] sm:$0xff] }
  0x96   : > { %v270_v54 = vperm.slane %v240_v51, %v256_v42  ;;  %v454_v51 = vld [vmem:[%s1430_s3 + $0xa0] sm:$0xff]  ;;  %608 = vmatpush.msrb.mxu1 %v516_v49  ;;  %587 = vmatpush.msra.mxu3 %v486_v52  ;;  %v521_v49 = vld [vmem:[%s1430_s3 + $0x2b8] sm:$0xff]  ;;  %v491_v52 = vld [vmem:[%s1430_s3 + $0x1c8] sm:$0xff] }
  0x97   : > { %v269_v55 = vsel %vm254_vm2, %v268_v50, %v267_v53  ;;  %v548_v50 = vld [vmem:[%s1430_s3 + $0x390] sm:$0xff]  ;;  %v514_v53 = vld [vmem:[%s1430_s3 + $0x280] sm:$0xff]  ;;  %567 = vmatpush.msra.mxu2 %v454_v51  ;;  %v459_v51 = vld [vmem:[%s1430_s3 + $0xc8] sm:$0xff] }
  0x98   : > { %v271_v57 = vsel %vm258_vm3, %v270_v54, %v269_v55  ;;  %628 = vmatpush.msrb.mxu0 %v548_v50  ;;  %v546_v54 = vld [vmem:[%s1430_s3 + $0x380] sm:$0xff]  ;;  %v452_v55 = vld [vmem:[%s1430_s3 + $0x90] sm:$0xff]  ;;  %609 = vmatpush.msrb.mxu1 %v514_v53  ;;  %v553_v50 = vld [vmem:[%s1430_s3 + $0x3b8] sm:$0xff] }
  0x99   : > { %v274_v58 = vsel %vm273_vm4, %v259_v56, %v271_v57  ;;  %v484_v56 = vld [vmem:[%s1430_s3 + $0x190] sm:$0xff]  ;;  %568 = vmatpush.msra.mxu2 %v452_v55  ;;  %v519_v53 = vld [vmem:[%s1430_s3 + $0x2a8] sm:$0xff]  ;;  %v457_v55 = vld [vmem:[%s1430_s3 + $0xb8] sm:$0xff] }
  0x9a   : > { %842 = vmatmul.msk.f32.vlgmr.msra.gmra.mxu0 %vm279_vm5, %v274_v58  ;;  %v512_v57 = vld [vmem:[%s1430_s3 + $0x270] sm:$0xff]  ;;  %588 = vmatpush.msra.mxu3 %v484_v56  ;;  %v489_v56 = vld [vmem:[%s1430_s3 + $0x1b8] sm:$0xff] }
  0x9b   : > { %v544_v58 = vld [vmem:[%s1430_s3 + $0x370] sm:$0xff]  ;;  %629 = vmatpush.msrb.mxu0 %v546_v54  ;;  %610 = vmatpush.msrb.mxu1 %v512_v57  ;;  %v551_v54 = vld [vmem:[%s1430_s3 + $0x3a8] sm:$0xff]  ;;  %v517_v57 = vld [vmem:[%s1430_s3 + $0x298] sm:$0xff] }
  0x9c   : > { %569 = vmatpush.msra.mxu2 %v450_v59  ;;  %v455_v59 = vld [vmem:[%s1430_s3 + $0xa8] sm:$0xff] }
  0x9d   : > { %630 = vmatpush.msrb.mxu0 %v544_v58  ;;  %v549_v58 = vld [vmem:[%s1430_s3 + $0x398] sm:$0xff] }
 0x117   : > { %v300_v60 = vpop.f32.mrf.mxu0 }
 0x118   : > { %v303_v61 = vmax.f32 %v300_v60, 0.0  ;;  %v482_v60 = vld [vmem:[%s1430_s3 + $0x180] sm:$0xff] }
 0x119   : > { %589 = vmatpush.msra.mxu3 %v482_v60  ;;  %v487_v60 = vld [vmem:[%s1430_s3 + $0x1a8] sm:$0xff] }
 0x11a   : > { %v305_v62 = vrot.slane %v303_v61, 1 }
 0x11b   : > { %590 = vmatpush.msra.mxu3 %v480_v3  ;;  %v485_v3 = vld [vmem:[%s1430_s3 + $0x198] sm:$0xff] }
 0x11c   : > { %v307_v63 = vadd.f32 %v305_v62, %v303_v61  ;;  %v510_v61 = vld [vmem:[%s1430_s3 + $0x260] sm:$0xff] }
 0x11d   : > { %v542_v62 = vld [vmem:[%s1430_s3 + $0x360] sm:$0xff]  ;;  %611 = vmatpush.msrb.mxu1 %v510_v61  ;;  %v515_v61 = vld [vmem:[%s1430_s3 + $0x288] sm:$0xff] }
 0x11e   : > { %844 = vmatmul.msk.f32.vlgmr.msra.gmra.mxu1 %vm309_vm7, %v307_v63  ;;  %v448_v63 = vld [vmem:[%s1430_s3 + $0x70] sm:$0xff]  ;;  %631 = vmatpush.msrb.mxu0 %v542_v62  ;;  %v547_v62 = vld [vmem:[%s1430_s3 + $0x388] sm:$0xff] }
 0x11f   : > { %570 = vmatpush.msra.mxu2 %v448_v63  ;;  %612 = vmatpush.msrb.mxu1 %v508_v4  ;;  %v453_v63 = vld [vmem:[%s1430_s3 + $0x98] sm:$0xff] }
 0x120   : > { %632 = vmatpush.msrb.mxu0 %v540_v6  ;;  %v513_v4 = vld [vmem:[%s1430_s3 + $0x278] sm:$0xff] }
 0x121   : > { %v545_v6 = vld [vmem:[%s1430_s3 + $0x378] sm:$0xff] }
 0x19b   : > { %v334_v11 = vpop.f32.mrf.mxu1 }
 0x19c   : > { %v845_v12 = vmul.f32 -1.442695, %v334_v11  ;;  %v446_v11 = vld [vmem:[%s1430_s3 + $0x60] sm:$0xff] }
 0x19d   : > { %571 = vmatpush.msra.mxu2 %v446_v11  ;;  %v451_v11 = vld [vmem:[%s1430_s3 + $0x88] sm:$0xff] }
 0x19e   : > { %869 = vpow2.f32 %v845_v12  ;;  %v478_v12 = vld [vmem:[%s1430_s3 + $0x160] sm:$0xff] }
 0x19f   : > { %591 = vmatpush.msra.mxu3 %v478_v12  ;;  %572 = vmatpush.msra.mxu2 %v444_v15  ;;  %v483_v12 = vld [vmem:[%s1430_s3 + $0x188] sm:$0xff]  ;;  %v449_v15 = vld [vmem:[%s1430_s3 + $0x78] sm:$0xff] }
 0x1a1   : > { %592 = vmatpush.msra.mxu3 %v476_v16  ;;  %573 = vmatpush.msra.mxu2 %v442_v19  ;;  %v481_v16 = vld [vmem:[%s1430_s3 + $0x178] sm:$0xff]  ;;  %v447_v19 = vld [vmem:[%s1430_s3 + $0x68] sm:$0xff] }
 0x1a3   : > { %593 = vmatpush.msra.mxu3 %v474_v20  ;;  %574 = vmatpush.msra.mxu2 %v440_v23  ;;  %v479_v20 = vld [vmem:[%s1430_s3 + $0x168] sm:$0xff]  ;;  %v445_v23 = vld [vmem:[%s1430_s3 + $0x58] sm:$0xff] }
 0x1a4   : > { %v870_v13 = vpop.eup %869 }
 0x1a5   : > { %v340_v14 = vadd.f32 1.0, %v870_v13  ;;  %v506_v13 = vld [vmem:[%s1430_s3 + $0x240] sm:$0xff]  ;;  %594 = vmatpush.msra.mxu3 %v472_v24  ;;  %575 = vmatpush.msra.mxu2 %v438_v27  ;;  %v477_v24 = vld [vmem:[%s1430_s3 + $0x158] sm:$0xff]  ;;  %v443_v27 = vld [vmem:[%s1430_s3 + $0x48] sm:$0xff] }
 0x1a6   : > { %613 = vmatpush.msrb.mxu1 %v506_v13  ;;  %v511_v13 = vld [vmem:[%s1430_s3 + $0x268] sm:$0xff] }
 0x1a7   : > { %871 = vrcp.f32 %v340_v14  ;;  %v352_v33 = vand.u32 2147483648, %v340_v14  ;;  %v350_v38 = vand.u32 2147483647, %v340_v14  ;;  %vm346_vm9 = vweird.f32 %v340_v14  ;;  %595 = vmatpush.msra.mxu3 %v470_v28  ;;  %v475_v28 = vld [vmem:[%s1430_s3 + $0x148] sm:$0xff] }
 0x1a8   : > { %614 = vmatpush.msrb.mxu1 %v504_v17  ;;  %v509_v17 = vld [vmem:[%s1430_s3 + $0x258] sm:$0xff] }
 0x1a9   : > { %v353_v42 = vor.u32 1.1754944e-38, %v352_v33  ;;  %vm351_vm11 = vcmp.eq.f32.partialorder %v350_v38, 8.507059e+37  ;;  %v436_v33 = vld [vmem:[%s1430_s3 + $0x10] sm:$0xff]  ;;  %v466_v38 = vld [vmem:[%s1430_s3 + $0x100] sm:$0xff]  ;;  %596 = vmatpush.msra.mxu3 %v468_v34  ;;  %v501_v34 = vld [vmem:[%s1430_s3 + $0x218] sm:$0xff] }
 0x1aa   : > { %576 = vmatpush.msra.mxu2 %v436_v33  ;;  %v473_v33 = vld [vmem:[%s1430_s3 + $0x138] sm:$0xff] }
 0x1ab   : > { %597 = vmatpush.msra.mxu3 %v466_v38  ;;  %v471_v38 = vld [vmem:[%s1430_s3 + $0x128] sm:$0xff] }
 0x1ad   : > { %v872_v21 = vpop.eup %871  ;;  %662 = vmatpush.msrb.mxu3 %v497_v40  ;;  %v531_v40 = vld [vmem:[%s1430_s3 + $0x308] sm:$0xff] }
 0x1ae   : > { %v342_v25 = vmul.f32 %v872_v21, %v340_v14  ;;  %vm347_vm8 = vweird.f32 %v872_v21  ;;  %v538_v14 = vld [vmem:[%s1430_s3 + $0x340] sm:$0xff] }
 0x1af   : > { %vm348_vm10 = vmor %vm346_vm9, %vm347_vm8  ;;  %633 = vmatpush.msrb.mxu0 %v538_v14  ;;  %v543_v14 = vld [vmem:[%s1430_s3 + $0x368] sm:$0xff] }
 0x1b0   : > { %v343_v31 = vsub.f32 1.0, %v342_v25  ;;  %v500_v25 = vld [vmem:[%s1430_s3 + $0x210] sm:$0xff] }
 0x1b1   : > { %634 = vmatpush.msrb.mxu0 %v536_v18  ;;  %v541_v18 = vld [vmem:[%s1430_s3 + $0x358] sm:$0xff] }
 0x1b2   : > { %v344_v37 = vmul.f32 %v872_v21, %v343_v31  ;;  %v529_v31 = vld [vmem:[%s1430_s3 + $0x2f8] sm:$0xff] }
 0x1b3   : > { %635 = vmatpush.msrb.mxu0 %v534_v22  ;;  %v539_v22 = vld [vmem:[%s1430_s3 + $0x348] sm:$0xff] }
 0x1b4   : > { %v345_v41 = vadd.f32 %v872_v21, %v344_v37  ;;  %v434_v37 = vld [vmem:[%s1430_s3] sm:$0xff] }
 0x1b5   : > { %636 = vmatpush.msrb.mxu0 %v532_v26  ;;  %577 = vmatpush.msra.mxu2 %v434_v37  ;;  %v537_v26 = vld [vmem:[%s1430_s3 + $0x338] sm:$0xff]  ;;  %v439_v37 = vld [vmem:[%s1430_s3 + $0x28] sm:$0xff] }
 0x1b6   : > { %v349_v43 = vsel %vm348_vm10, %v872_v21, %v345_v41  ;;  %v502_v21 = vld [vmem:[%s1430_s3 + $0x220] sm:$0xff]  ;;  %v525_v41 = vld [vmem:[%s1430_s3 + $0x2d8] sm:$0xff] }
 0x1b7   : > { %v354_v44 = vsel %vm351_vm11, %v353_v42, %v349_v43  ;;  %615 = vmatpush.msrb.mxu1 %v502_v21  ;;  %637 = vmatpush.msrb.mxu0 %v530_v30  ;;  %v557_v42 = vld [vmem:[%s1430_s3 + $0x3d8] sm:$0xff]  ;;  %v463_v43 = vld [vmem:[%s1430_s3 + $0xe8] sm:$0xff] }
 0x1b8   : > { %v356_v45 = vperm.slane %v354_v44, 0  ;;  %642 = vmatpush.msrb.mxu2 %v465_v39  ;;  %v495_v44 = vld [vmem:[%s1430_s3 + $0x1e8] sm:$0xff] }
 0x1b9   : > { %616 = vmatpush.msrb.mxu1 %v500_v25  ;;  %702 = vmatpush.msra.mxu0 %v561_v32  ;;  %v507_v21 = vld [vmem:[%s1430_s3 + $0x248] sm:$0xff]  ;;  %v505_v25 = vld [vmem:[%s1430_s3 + $0x238] sm:$0xff] }
 0x1ba   : > { %373 = vperm.xlu1 %864, %v356_v45   ;;  %367 = vperm.xlu0 %863, %v356_v45   ;;  %v535_v30 = vld [vmem:[%s1430_s3 + $0x328] sm:$0xff]  ;;  %v441_v32 = vld [vmem:[%s1430_s3 + $0x38] sm:$0xff] }
 0x1bb   : > { %361 = vperm.xlu2 %862, %v356_v45   ;;  %617 = vmatpush.msrb.mxu1 %v498_v29  ;;  %v503_v29 = vld [vmem:[%s1430_s3 + $0x228] sm:$0xff] }
 0x1bc   : > { %703 = vmatpush.msra.mxu0 %v559_v36  ;;  %643 = vmatpush.msrb.mxu2 %v463_v43  ;;  %v892_v36 = vmov 32.0   ;;  %v499_v39 = vld [vmem:[%s1430_s3 + $0x208] sm:$0xff] }
 0x1bd   : > { %682 = vmatpush.msra.mxu1 %v529_v31  ;;  %663 = vmatpush.msrb.mxu3 %v495_v44  ;;  %873 = vrcp.f32 %v892_v36  ;;  %v435_v43 = vld [vmem:[%s1430_s3 + $0x8] sm:$0xff] }
 0x1be   : > { %704 = vmatpush.msra.mxu0 %v557_v42  ;;  %644 = vmatpush.msrb.mxu2 %v461_v47  ;;  %v469_v42 = vld [vmem:[%s1430_s3 + $0x118] sm:$0xff]  ;;  %v467_v44 = vld [vmem:[%s1430_s3 + $0x108] sm:$0xff] }
 0x1bf   : > { %683 = vmatpush.msra.mxu1 %v527_v35  ;;  %664 = vmatpush.msrb.mxu3 %v493_v48  ;;  %v533_v35 = vld [vmem:[%s1430_s3 + $0x318] sm:$0xff] }
 0x1c0   : > { %645 = vmatpush.msrb.mxu2 %v459_v51 }
 0x1c1   : > { %684 = vmatpush.msra.mxu1 %v525_v41  ;;  %665 = vmatpush.msrb.mxu3 %v491_v52  ;;  %v437_v41 = vld [vmem:[%s1430_s3 + $0x18] sm:$0xff] }
 0x1c2   : > { %866 = vset.pattern.permute.xlu0 %v377_v46  ;;  %646 = vmatpush.msrb.mxu2 %v457_v55 }
 0x1c3   : > { %865 = vset.pattern.permute.xlu2 %v377_v46  ;;  %v555_v46 = vld [vmem:[%s1430_s3 + $0x3c8] sm:$0xff]  ;;  %666 = vmatpush.msrb.mxu3 %v489_v56 }
 0x1c4   : > { %705 = vmatpush.msra.mxu0 %v555_v46  ;;  %647 = vmatpush.msrb.mxu2 %v455_v59 }
 0x1c5   : > { %667 = vmatpush.msrb.mxu3 %v487_v60 }
 0x1c6   : > { %706 = vmatpush.msra.mxu0 %v553_v50  ;;  %648 = vmatpush.msrb.mxu2 %v453_v63 }
 0x1c7   : > { %668 = vmatpush.msrb.mxu3 %v485_v3 }
 0x1c8   : > { %707 = vmatpush.msra.mxu0 %v551_v54  ;;  %649 = vmatpush.msrb.mxu2 %v451_v11 }
 0x1c9   : > { %669 = vmatpush.msrb.mxu3 %v483_v12 }
 0x1ca   : > { %708 = vmatpush.msra.mxu0 %v549_v58  ;;  %650 = vmatpush.msrb.mxu2 %v449_v15 }
 0x1cb   : > { %379 = vperm.xlu2 %865, %v356_v45   ;;  %v523_v45 = vld [vmem:[%s1430_s3 + $0x2c8] sm:$0xff]  ;;  %670 = vmatpush.msrb.mxu3 %v481_v16 }
 0x1cc   : > { %685 = vmatpush.msra.mxu1 %v523_v45  ;;  %709 = vmatpush.msra.mxu0 %v547_v62  ;;  %v874_v45 = vpop.eup %873 }
 0x1cd   : > { %651 = vmatpush.msrb.mxu2 %v447_v19  ;;  %671 = vmatpush.msrb.mxu3 %v479_v20  ;;  %v408_v55 = vmul.f32 32.0, %v874_v45  ;;  %vm412_vm12 = vweird.f32 %v874_v45 }
 0x1ce   : > { %686 = vmatpush.msra.mxu1 %v521_v49  ;;  %710 = vmatpush.msra.mxu0 %v545_v6 }
 0x1cf   : > { %652 = vmatpush.msrb.mxu2 %v445_v23  ;;  %672 = vmatpush.msrb.mxu3 %v477_v24  ;;  %v409_v60 = vsub.f32 1.0, %v408_v55 }
 0x1d0   : > { %687 = vmatpush.msra.mxu1 %v519_v53  ;;  %711 = vmatpush.msra.mxu0 %v543_v14 }
 0x1d1   : > { %653 = vmatpush.msrb.mxu2 %v443_v27  ;;  %673 = vmatpush.msrb.mxu3 %v475_v28 }
 0x1d2   : > { %688 = vmatpush.msra.mxu1 %v517_v57  ;;  %712 = vmatpush.msra.mxu0 %v541_v18 }
 0x1d3   : > { %654 = vmatpush.msrb.mxu2 %v441_v32  ;;  %674 = vmatpush.msrb.mxu3 %v473_v33 }
 0x1d4   : > { %689 = vmatpush.msra.mxu1 %v515_v61  ;;  %713 = vmatpush.msra.mxu0 %v539_v22 }
 0x1d5   : > { %655 = vmatpush.msrb.mxu2 %v439_v37  ;;  %675 = vmatpush.msrb.mxu3 %v471_v38 }
 0x1d6   : > { %690 = vmatpush.msra.mxu1 %v513_v4  ;;  %714 = vmatpush.msra.mxu0 %v537_v26 }
 0x1d7   : > { %656 = vmatpush.msrb.mxu2 %v437_v41  ;;  %676 = vmatpush.msrb.mxu3 %v469_v42 }
 0x1d8   : > { %691 = vmatpush.msra.mxu1 %v511_v13  ;;  %715 = vmatpush.msra.mxu0 %v535_v30  ;;  %v410_v13 = vmul.f32 %v874_v45, %v409_v60 }
 0x1d9   : > { %657 = vmatpush.msrb.mxu2 %v435_v43  ;;  %677 = vmatpush.msrb.mxu3 %v467_v44 }
 0x1da   : > { %692 = vmatpush.msra.mxu1 %v509_v17  ;;  %716 = vmatpush.msra.mxu0 %v533_v35  ;;  %v411_v22 = vadd.f32 %v874_v45, %v410_v13 }
 0x1dc   : > { %693 = vmatpush.msra.mxu1 %v507_v21  ;;  %717 = vmatpush.msra.mxu0 %v531_v40 }
 0x1de   : > { %694 = vmatpush.msra.mxu1 %v505_v25 }
 0x1e0   : > { %695 = vmatpush.msra.mxu1 %v503_v29 }
 0x1e2   : > { %696 = vmatpush.msra.mxu1 %v501_v34 }
 0x1e4   : > { %697 = vmatpush.msra.mxu1 %v499_v39 }
 0x215   : > { %v362_v31 = vpop.permute.xlu2 %361 }
 0x216   : > { %v1372_v47 = vmul.f32 %v362_v31, %v934_v0  ;;  %v1375_v48 = vmul.f32 %v362_v31, %v936_v1  ;;  %v413_v31 = vsel %vm412_vm12, %v874_v45, %v411_v22 }
 0x225   : > { %v380_v46 = vpop.permute.xlu2 %379 }
 0x226   : > { %v1390_v0 = vmul.f32 %v380_v46, %v952_v9  ;;  %v1393_v1 = vmul.f32 %v380_v46, %v954_v10 }
 0x22c   : > { %v374_v49 = vpop.permute.xlu1 %373  ;;  %v368_v50 = vpop.permute.xlu0 %367 }
 0x22d   : > { %v1378_v51 = vmul.f32 %v374_v49, %v938_v2  ;;  %v1381_v52 = vmul.f32 %v374_v49, %v944_v5  ;;  %v1384_v53 = vmul.f32 %v368_v50, %v948_v7  ;;  %v1387_v54 = vmul.f32 %v368_v50, %v950_v8 }
 0x22f   : > { %v416_v2 = vmax.f32 %v1372_v47, %v1378_v51  ;;  %v425_v5 = vmax.f32 %v1375_v48, %v1381_v52  ;;  %v389_v7 = vadd.f32 %v1384_v53, %v1372_v47  ;;  %v398_v8 = vadd.f32 %v1387_v54, %v1375_v48 }
 0x230   : > { %v417_v9 = vmax.f32 %v1384_v53, %v1390_v0  ;;  %v426_v10 = vmax.f32 %v1387_v54, %v1393_v1 }
 0x231   : > { %v390_v56 = vadd.f32 %v389_v7, %v1378_v51  ;;  %v399_v57 = vadd.f32 %v398_v8, %v1381_v52 }
 0x232   : > { %v418_v58 = vmax.f32 %v416_v2, %v417_v9  ;;  %v427_v59 = vmax.f32 %v425_v5, %v426_v10 }
 0x233   : > { %v391_v61 = vadd.f32 %v390_v56, %v1390_v0  ;;  %v400_v62 = vadd.f32 %v399_v57, %v1393_v1 }
 0x234   : > { %v419_v63 = vrot.slane %v418_v58, 4  ;;  %v428_v3 = vrot.slane %v427_v59, 4 }
 0x235   : > { %v392_v4 = vrot.slane %v391_v61, 4  ;;  %v401_v6 = vrot.slane %v400_v62, 4 }
 0x236   : > { %v420_v11 = vmax.f32 %v418_v58, %v419_v63  ;;  %v429_v12 = vmax.f32 %v427_v59, %v428_v3 }
 0x237   : > { %v393_v14 = vadd.f32 %v392_v4, %v391_v61  ;;  %v402_v15 = vadd.f32 %v401_v6, %v400_v62 }
 0x238   : > { %v421_v16 = vrot.slane %v420_v11, 2  ;;  %v430_v17 = vrot.slane %v429_v12, 2 }
 0x239   : > { %v394_v18 = vrot.slane %v393_v14, 2  ;;  %v403_v19 = vrot.slane %v402_v15, 2 }
 0x23a   : > { %v422_v20 = vmax.f32 %v420_v11, %v421_v16  ;;  %v431_v21 = vmax.f32 %v429_v12, %v430_v17 }
 0x23b   : > { %v395_v23 = vadd.f32 %v394_v18, %v393_v14  ;;  %v404_v24 = vadd.f32 %v403_v19, %v402_v15 }
 0x23c   : > { %v423_v25 = vrot.slane %v422_v20, 1  ;;  %v432_v26 = vrot.slane %v431_v21, 1 }
 0x23d   : > { %v396_v27 = vrot.slane %v395_v23, 1  ;;  %v405_v28 = vrot.slane %v404_v24, 1 }
 0x23e   : > { %v424_v29 = vmax.f32 %v422_v20, %v423_v25  ;;  %v433_v30 = vmax.f32 %v431_v21, %v432_v26 }
 0x23f   : > { %v397_v32 = vadd.f32 %v396_v27, %v395_v23  ;;  %v406_v33 = vadd.f32 %v405_v28, %v404_v24 }
 0x240   : > { %618 = vmatmul.f32.vlgmr.msrb.gmra.mxu1 %v424_v29  ;;  %638 = vmatmul.f32.vlgmr.msrb.gmra.mxu0 %v433_v30 }
 0x241   : > { %v414_v34 = vmul.f32 %v413_v31, %v397_v32  ;;  %v415_v35 = vmul.f32 %v413_v31, %v406_v33 }
 0x243   : > { %578 = vmatmul.f32.vlgmr.msra.gmra.mxu2 %v414_v34  ;;  %598 = vmatmul.f32.vlgmr.msra.gmra.mxu3 %v415_v35 }
 0x248   : > { %698 = vmatmul.f32.vlgmr.msra.gmra.mxu1 %v424_v29  ;;  %718 = vmatmul.f32.vlgmr.msra.gmra.mxu0 %v433_v30 }
 0x24b   : > { %658 = vmatmul.f32.vlgmr.msrb.gmra.mxu2 %v414_v34  ;;  %678 = vmatmul.f32.vlgmr.msrb.gmra.mxu3 %v415_v35 }
 0x2bd   : > { %v619_v36 = vpop.f32.mrf.mxu1  ;;  %v639_v40 = vpop.f32.mrf.mxu0 }
 0x2c5   : > { %v699_v49 = vpop.f32.mrf.mxu1  ;;  %v719_v55 = vpop.f32.mrf.mxu0 }
 0x2c6   : > { %v579_v37 = vpop.f32.mrf.mxu2  ;;  %v599_v38 = vpop.f32.mrf.mxu3 }
 0x2c7   : > { %v600_v39 = vadd.f32 %v599_v38, %v579_v37 }
 0x2c9   : > { %v620_v41 = vadd.f32 %v619_v36, %v600_v39 }
 0x2cb   : > { %v640_v42 = vadd.f32 %v639_v40, %v620_v41 }
 0x2cd   : > { %v846_v43 = vmul.f32 -1.442695, %v640_v42 }
 0x2ce   : > { %v659_v44 = vpop.f32.mrf.mxu2  ;;  %v679_v45 = vpop.f32.mrf.mxu3 }
 0x2cf   : > { %875 = vpow2.f32 %v846_v43  ;;  %v680_v46 = vadd.f32 %v679_v45, %v659_v44 }
 0x2d1   : > { %v700_v50 = vadd.f32 %v699_v49, %v680_v46 }
 0x2d3   : > { %v720_v2 = vadd.f32 %v719_v55, %v700_v50 }
 0x2d5   : > { %v876_v5 = vpop.eup %875  ;;  %v847_v7 = vmul.f32 -1.442695, %v720_v2 }
 0x2d6   : > { %v728_v8 = vadd.f32 1.0, %v876_v5 }
 0x2d7   : > { %877 = vpow2.f32 %v847_v7 }
 0x2d8   : > { %879 = vrcp.f32 %v728_v8  ;;  %v741_v59 = vand.u32 2147483648, %v728_v8  ;;  %v739_v61 = vand.u32 2147483647, %v728_v8  ;;  %vm735_vm14 = vweird.f32 %v728_v8 }
 0x2da   : > { %v742_v3 = vor.u32 1.1754944e-38, %v741_v59  ;;  %vm740_vm0 = vcmp.eq.f32.partialorder %v739_v61, 8.507059e+37 }
 0x2dd   : > { %v878_v9 = vpop.eup %877 }
 0x2de   : > { %v880_v10 = vpop.eup %879  ;;  %v729_v56 = vadd.f32 1.0, %v878_v9 }
 0x2df   : > { %v731_v57 = vmul.f32 %v880_v10, %v728_v8  ;;  %vm736_vm13 = vweird.f32 %v880_v10 }
 0x2e0   : > { %881 = vrcp.f32 %v729_v56  ;;  %vm737_vm15 = vmor %vm735_vm14, %vm736_vm13  ;;  %v756_v17 = vand.u32 2147483648, %v729_v56  ;;  %v754_v20 = vand.u32 2147483647, %v729_v56  ;;  %vm750_vm2 = vweird.f32 %v729_v56 }
 0x2e1   : > { %v732_v58 = vsub.f32 1.0, %v731_v57 }
 0x2e2   : > { %v757_v22 = vor.u32 1.1754944e-38, %v756_v17  ;;  %vm755_vm4 = vcmp.eq.f32.partialorder %v754_v20, 8.507059e+37 }
 0x2e3   : > { %v733_v60 = vmul.f32 %v880_v10, %v732_v58 }
 0x2e5   : > { %v734_v62 = vadd.f32 %v880_v10, %v733_v60 }
 0x2e6   : > { %v882_v63 = vpop.eup %881 }
 0x2e7   : > { %v738_v4 = vsel %vm737_vm15, %v880_v10, %v734_v62  ;;  %v746_v6 = vmul.f32 %v882_v63, %v729_v56  ;;  %vm751_vm1 = vweird.f32 %v882_v63 }
 0x2e8   : > { %v743_v11 = vsel %vm740_vm0, %v742_v3, %v738_v4  ;;  %vm752_vm3 = vmor %vm750_vm2, %vm751_vm1 }
 0x2e9   : > { %v760_v12 = vperm.slane %v743_v11, 0  ;;  %v747_v13 = vsub.f32 1.0, %v746_v6 }
 0x2eb   : > { %v762_v14 = vmul.f32 %v760_v12, %v1372_v47  ;;  %v764_v15 = vmul.f32 %v760_v12, %v1384_v53  ;;  %v766_v16 = vmul.f32 %v760_v12, %v1378_v51  ;;  %v768_v18 = vmul.f32 %v760_v12, %v1390_v0 }
 0x2ec   : > { %v748_v19 = vmul.f32 %v882_v63, %v747_v13 }
 0x2ed   : > { %770 = vst [vmem:[%s197_s10] sm:$0xff] %v762_v14 }
 0x2ee   : > { %772 = vst [vmem:[%s197_s10 + $0x10] sm:$0xff] %v764_v15  ;;  %v749_v21 = vadd.f32 %v882_v63, %v748_v19 }
 0x2ef   : > { %774 = vst [vmem:[%s197_s10 + $0x20] sm:$0xff] %v766_v16 }
 0x2f0   : > { %776 = vst [vmem:[%s197_s10 + $0x30] sm:$0xff] %v768_v18  ;;  %v753_v23 = vsel %vm752_vm3, %v882_v63, %v749_v21 }
 0x2f1   : > { %v758_v47 = vsel %vm755_vm4, %v757_v22, %v753_v23 }
 0x2f2   : > { %v761_v53 = vperm.slane %v758_v47, 0 }
 0x2f4   : > { %v763_v51 = vmul.f32 %v761_v53, %v1375_v48  ;;  %v765_v24 = vmul.f32 %v761_v53, %v1387_v54  ;;  %v767_v0 = vmul.f32 %v761_v53, %v1381_v52  ;;  %v769_v25 = vmul.f32 %v761_v53, %v1393_v1 }
 0x2f6   : > { %771 = vst [vmem:[%s197_s10 + $0x8] sm:$0xff] %v763_v51 }
 0x2f7   : > { %773 = vst [vmem:[%s197_s10 + $0x18] sm:$0xff] %v765_v24 }
 0x2f8   : > { %775 = vst [vmem:[%s197_s10 + $0x28] sm:$0xff] %v767_v0 }
 0x2f9   : > { %777 = vst [vmem:[%s197_s10 + $0x38] sm:$0xff] %v769_v25 }
 0x2fa PF: > { %s14_s15 = sadd.s32 1, %s889_s15  }
 0x2fb   : > { %p11_p4 = scmp.ge.s32.totalorder %s14_s15, 4  }
 0x2fd   :  { %13 = sbr.rel (!%p11_p4) target bundleno = 1 (0x1), region = 66 }

</bundles_post_ra>
